<compile_context>
chip_gen: v7x
topology: tpu7x:2x2x1
jax: 0.10.0
libtpu: 0.0.40
codegen_flags: <defaults>
</compile_context>

<pallas_src>
from functools import partial

import jax
import jax.numpy as jnp
from jax.experimental import pallas as pl
from jax.experimental.pallas import tpu as pltpu

_CHUNK = 512  # lanes per in-kernel sub-chunk (multiple of the 128-lane vreg width)


def _make_mlp_kernel(n_layers, chunk, n_chunks):
    """Build a fused MLP kernel for one (F, batch_tile) tile, batch on the lane axis."""

    def kernel(x_ref, *refs):
        o_ref = refs[-1]
        params = refs[:-1]
        # Small weights/biases: load once per tile (constant index maps -> VMEM-resident).
        ws = [params[2 * li][...] for li in range(n_layers)]
        bs = [params[2 * li + 1][...] for li in range(n_layers)]
        # Static unroll over 512-lane chunks: caps any single live activation at
        # ~(chunk/128)*ceil(out/8) vregs while keeping the matmul N dim MXU-wide.
        for c in range(n_chunks):
            start = c * chunk  # static, 128-aligned
            h = x_ref[:, pl.ds(start, chunk)]
            for li in range(n_layers):
                h = jnp.dot(ws[li], h, preferred_element_type=jnp.float32) + bs[li]  # MXU
                if li < n_layers - 1:
                    h = jnp.maximum(h, 0.0)      # ReLU (VPU)
                else:
                    h = jax.nn.sigmoid(h)        # Sigmoid (EUP exp + VPU)
            o_ref[:, pl.ds(start, chunk)] = h.astype(o_ref.dtype)  # lane-dense store

    return kernel


def _pick_batch_tile(B):
    """Small B: one minimally padded tile. Large B: big tiles, but always >= 2 tiles (v7x)."""
    if B <= 512:
        return max(128, ((B + 127) // 128) * 128)
    for bt in (2048, 1024, 512):
        if (B + bt - 1) // bt >= 2:
            return bt
    return 512


@partial(jax.jit, static_argnames=("batch_tile",))
def _forward_jit(x, params, batch_tile):
    x = jnp.asarray(x, jnp.float32)
    B, F = x.shape
    assert batch_tile % 128 == 0, "batch_tile must be a multiple of 128 (lane width)"
    chunk = min(batch_tile, _CHUNK)
    assert batch_tile % chunk == 0
    n_chunks = batch_tile // chunk

    n_tiles = (B + batch_tile - 1) // batch_tile
    B_pad = n_tiles * batch_tile

    # Pad the batch, then transpose so batch sits on the lane / MXU-N axis (fused under jit).
    x_t = jnp.pad(x, ((0, B_pad - B), (0, 0))).T  # (F, B_pad)

    in_specs = [pl.BlockSpec((F, batch_tile), lambda i: (0, i))]
    flat_params = []
    flops = 0
    param_bytes = 0
    for (w, b) in params:
        w = jnp.asarray(w, jnp.float32)
        b = jnp.asarray(b, jnp.float32)
        # Whole-array blocks, constant index maps -> fetched once, not re-DMA'd per grid step.
        in_specs.append(pl.BlockSpec(w.shape, lambda i: (0, 0)))
        in_specs.append(pl.BlockSpec(b.shape, lambda i: (0, 0)))
        flat_params += [w, b]
        flops += 2 * B_pad * int(w.shape[0]) * int(w.shape[1])
        param_bytes += 4 * (int(w.size) + int(b.size))

    out_specs = pl.BlockSpec((1, batch_tile), lambda i: (0, i))  # lane-dense output tile
    n_layers = len(flat_params) // 2
    kernel = _make_mlp_kernel(n_layers, chunk, n_chunks)

    out_t = pl.pallas_call(
        kernel,
        out_shape=jax.ShapeDtypeStruct((1, B_pad), jnp.float32),
        grid_spec=pltpu.PrefetchScalarGridSpec(
            num_scalar_prefetch=0,
            grid=(n_tiles,),
            in_specs=in_specs,
            out_specs=out_specs,
        ),
        compiler_params=pltpu.CompilerParams(
            # Batch tiles are independent -> shard across TensorCores on v7x when n_tiles >= 2.
            dimension_semantics=("parallel",),
            # Explicit scoped-VMEM budget: > v5e's 16 MiB default, <= v7x's 64 MiB physical.
            vmem_limit_bytes=32 * 1024 * 1024,
        ),
        cost_estimate=pl.CostEstimate(
            flops=flops,
            transcendentals=B_pad,  # one exp per sigmoid output
            bytes_accessed=4 * (F * B_pad + B_pad) + param_bytes,
        ),
    )(x_t, *flat_params)

    return out_t[0, :B].reshape(B, 1)


def deep_neural_network_forward(x, params, *, batch_tile=None):
    """x: [batch, in_features]; params: list of (w, b) with w: [out, in], b: [out, 1].

    Returns [batch, 1] f32 == Sigmoid(Linear(...ReLU(Linear(x))...)), matching
    DeepNeuralNetwork.forward.
    """
    x = jnp.asarray(x, jnp.float32)
    if batch_tile is None:
        batch_tile = _pick_batch_tile(x.shape[0])
    return _forward_jit(x, params, batch_tile=batch_tile)


def init_params(key, input_size, hidden_sizes):
    """Deterministic init mirroring the module's layer shapes (PyTorch [out, in] layout):
    hidden layers (Linear+ReLU) for each size in hidden_sizes, then Linear(last, 1)."""
    params = []
    sizes = [input_size] + list(hidden_sizes) + [1]
    for li in range(len(sizes) - 1):
        fan_in, fan_out = sizes[li], sizes[li + 1]
        key, kw, kb = jax.random.split(key, 3)
        bound = 1.0 / jnp.sqrt(fan_in)
        w = jax.random.uniform(kw, (fan_out, fan_in), jnp.float32, -bound, bound)
        b = jax.random.uniform(kb, (fan_out, 1), jnp.float32, -bound, bound)
        params.append((w, b))
    return params


def reference_forward(x, params):
    h = x
    for li, (w, b) in enumerate(params):
        h = h @ w.T + b.T
        if li < len(params) - 1:
            h = jnp.maximum(h, 0.0)
        else:
            h = jax.nn.sigmoid(h)
    return h


# TODO(synk): training utilities (fit/evaluate/BCE loss/Precision/Recall/F1/accuracy) are
# host-side orchestration in the PyTorch module and are intentionally not ported to Pallas.

if __name__ == "__main__":
    key = jax.random.PRNGKey(0)
    k_x, k_p = jax.random.split(key)

    batch = 16
    input_size = 4           # DeepNeuralNetwork default input_size=4
    hidden_sizes = (32, 16)  # corresponds to DeepNeuralNetwork(4, 32, 16)

    x = jax.random.normal(k_x, (batch, input_size), dtype=jnp.float32)
    params = init_params(k_p, input_size, hidden_sizes)

    out = deep_neural_network_forward(x, params)
    out = jax.block_until_ready(out)

    ref = reference_forward(x, params)
    assert out.shape == (batch, 1)
    assert jnp.allclose(out, ref, atol=1e-5, rtol=1e-5), "mismatch vs reference"

    print("KERNEL_OK")
</pallas_src>

<mosaic_0001>
module attributes {stable_mosaic.version = 11 : i64} {
  func.func @kernel(%arg0: i32, %arg1: memref<4x128xf32, #tpu.memory_space<vmem>>, %arg2: memref<32x4xf32, #tpu.memory_space<vmem>>, %arg3: memref<32x1xf32, #tpu.memory_space<vmem>>, %arg4: memref<16x32xf32, #tpu.memory_space<vmem>>, %arg5: memref<16x1xf32, #tpu.memory_space<vmem>>, %arg6: memref<1x16xf32, #tpu.memory_space<vmem>>, %arg7: memref<1x1xf32, #tpu.memory_space<vmem>>, %arg8: memref<1x128xf32, #tpu.memory_space<vmem>>) attributes {dimension_semantics = [#tpu.dimension_semantics<parallel>], iteration_bounds = array<i64: 1>, scalar_prefetch = 0 : i64, scratch_operands = 0 : i64, tpu.core_type = #tpu.core_type<tc>, window_params = [{transform_indices = @transform_0, window_bounds = array<i64: 4, 128>}, {pipeline_mode = #tpu.pipeline_mode<synchronous>, transform_indices = @transform_1, window_bounds = array<i64: 32, 4>}, {pipeline_mode = #tpu.pipeline_mode<synchronous>, transform_indices = @transform_2, window_bounds = array<i64: 32, 1>}, {pipeline_mode = #tpu.pipeline_mode<synchronous>, transform_indices = @transform_3, window_bounds = array<i64: 16, 32>}, {pipeline_mode = #tpu.pipeline_mode<synchronous>, transform_indices = @transform_4, window_bounds = array<i64: 16, 1>}, {pipeline_mode = #tpu.pipeline_mode<synchronous>, transform_indices = @transform_5, window_bounds = array<i64: 1, 16>}, {pipeline_mode = #tpu.pipeline_mode<synchronous>, transform_indices = @transform_6, window_bounds = array<i64: 1, 1>}, {transform_indices = @transform_7, window_bounds = array<i64: 1, 128>}]} {
    %c0 = arith.constant 0 : index
    %c0_0 = arith.constant 0 : index
    %0 = vector.load %arg2[%c0, %c0_0] : memref<32x4xf32, #tpu.memory_space<vmem>>, vector<32x4xf32>
    %c0_1 = arith.constant 0 : index
    %c0_2 = arith.constant 0 : index
    %1 = vector.load %arg4[%c0_1, %c0_2] : memref<16x32xf32, #tpu.memory_space<vmem>>, vector<16x32xf32>
    %c0_3 = arith.constant 0 : index
    %c0_4 = arith.constant 0 : index
    %2 = vector.load %arg6[%c0_3, %c0_4] : memref<1x16xf32, #tpu.memory_space<vmem>>, vector<1x16xf32>
    %c0_5 = arith.constant 0 : index
    %c0_6 = arith.constant 0 : index
    %3 = vector.load %arg3[%c0_5, %c0_6] : memref<32x1xf32, #tpu.memory_space<vmem>>, vector<32x1xf32>
    %c0_7 = arith.constant 0 : index
    %c0_8 = arith.constant 0 : index
    %4 = vector.load %arg5[%c0_7, %c0_8] : memref<16x1xf32, #tpu.memory_space<vmem>>, vector<16x1xf32>
    %c0_9 = arith.constant 0 : index
    %c0_10 = arith.constant 0 : index
    %5 = vector.load %arg7[%c0_9, %c0_10] : memref<1x1xf32, #tpu.memory_space<vmem>>, vector<1x1xf32>
    %c0_11 = arith.constant 0 : index
    %c0_12 = arith.constant 0 : index
    %6 = vector.load %arg1[%c0_11, %c0_12] : memref<4x128xf32, #tpu.memory_space<vmem>>, vector<4x128xf32>
    %cst = arith.constant dense<0.000000e+00> : vector<32x128xf32>
    %7 = tpu.matmul %0, %6, %cst {dimension_numbers = #tpu.dot_dimension_numbers<[1], [0], [0], [1], [0, 0, 1, 1], [], []>} : vector<32x4xf32>, vector<4x128xf32>, vector<32x128xf32> -> vector<32x128xf32>
    %8 = vector.broadcast %3 : vector<32x1xf32> to vector<32x128xf32>
    %9 = arith.addf %7, %8 : vector<32x128xf32>
    %cst_13 = arith.constant 0.000000e+00 : f32
    %10 = vector.broadcast %cst_13 : f32 to vector<32x128xf32>
    %11 = arith.maximumf %9, %10 : vector<32x128xf32>
    %cst_14 = arith.constant dense<0.000000e+00> : vector<16x128xf32>
    %12 = tpu.matmul %1, %11, %cst_14 {dimension_numbers = #tpu.dot_dimension_numbers<[1], [0], [0], [1], [0, 0, 1, 1], [], []>} : vector<16x32xf32>, vector<32x128xf32>, vector<16x128xf32> -> vector<16x128xf32>
    %13 = vector.broadcast %4 : vector<16x1xf32> to vector<16x128xf32>
    %14 = arith.addf %12, %13 : vector<16x128xf32>
    %cst_15 = arith.constant 0.000000e+00 : f32
    %15 = vector.broadcast %cst_15 : f32 to vector<16x128xf32>
    %16 = arith.maximumf %14, %15 : vector<16x128xf32>
    %cst_16 = arith.constant dense<0.000000e+00> : vector<1x128xf32>
    %17 = tpu.matmul %2, %16, %cst_16 {dimension_numbers = #tpu.dot_dimension_numbers<[1], [0], [0], [1], [0, 0, 1, 1], [], []>} : vector<1x16xf32>, vector<16x128xf32>, vector<1x128xf32> -> vector<1x128xf32>
    %18 = vector.broadcast %5 : vector<1x1xf32> to vector<1x128xf32>
    %19 = arith.addf %17, %18 : vector<1x128xf32>
    %20 = arith.negf %19 : vector<1x128xf32>
    %21 = math.exp %20 : vector<1x128xf32>
    %cst_17 = arith.constant 1.000000e+00 : f32
    %22 = vector.broadcast %cst_17 : f32 to vector<1x128xf32>
    %23 = arith.addf %22, %21 : vector<1x128xf32>
    %24 = arith.divf %22, %23 : vector<1x128xf32>
    %c0_18 = arith.constant 0 : index
    %c0_19 = arith.constant 0 : index
    %25 = vector.load %arg8[%c0_18, %c0_19] : memref<1x128xf32, #tpu.memory_space<vmem>>, vector<1x128xf32>
    tpu.vector_store %arg8[%c0_18, %c0_19], %24 {strides = array<i32>} : memref<1x128xf32, #tpu.memory_space<vmem>>, vector<1x128xf32>,
    return
  }
  func.func @transform_0(%arg0: i32) -> (i32, i32) {
    %c0_i32 = arith.constant 0 : i32
    %c0_i32_0 = arith.constant 0 : i32
    return %c0_i32, %arg0 : i32, i32
  }
  func.func @transform_1(%arg0: i32) -> (i32, i32) {
    %c0_i32 = arith.constant 0 : i32
    %c0_i32_0 = arith.constant 0 : i32
    %c0_i32_1 = arith.constant 0 : i32
    return %c0_i32, %c0_i32_0 : i32, i32
  }
  func.func @transform_2(%arg0: i32) -> (i32, i32) {
    %c0_i32 = arith.constant 0 : i32
    %c0_i32_0 = arith.constant 0 : i32
    %c0_i32_1 = arith.constant 0 : i32
    return %c0_i32, %c0_i32_0 : i32, i32
  }
  func.func @transform_3(%arg0: i32) -> (i32, i32) {
    %c0_i32 = arith.constant 0 : i32
    %c0_i32_0 = arith.constant 0 : i32
    %c0_i32_1 = arith.constant 0 : i32
    return %c0_i32, %c0_i32_0 : i32, i32
  }
  func.func @transform_4(%arg0: i32) -> (i32, i32) {
    %c0_i32 = arith.constant 0 : i32
    %c0_i32_0 = arith.constant 0 : i32
    %c0_i32_1 = arith.constant 0 : i32
    return %c0_i32, %c0_i32_0 : i32, i32
  }
  func.func @transform_5(%arg0: i32) -> (i32, i32) {
    %c0_i32 = arith.constant 0 : i32
    %c0_i32_0 = arith.constant 0 : i32
    %c0_i32_1 = arith.constant 0 : i32
    return %c0_i32, %c0_i32_0 : i32, i32
  }
  func.func @transform_6(%arg0: i32) -> (i32, i32) {
    %c0_i32 = arith.constant 0 : i32
    %c0_i32_0 = arith.constant 0 : i32
    %c0_i32_1 = arith.constant 0 : i32
    return %c0_i32, %c0_i32_0 : i32, i32
  }
  func.func @transform_7(%arg0: i32) -> (i32, i32) {
    %c0_i32 = arith.constant 0 : i32
    %c0_i32_0 = arith.constant 0 : i32
    return %c0_i32, %arg0 : i32, i32
  }
}

</mosaic_0001>

<bundles_post_ra>
// kernel: _forward_jit.1
= control target key start
LH: loop header
LB: loop body
LE: loop exit
PB: predicated region body
PF: predicated region fallthrough
CT: control target
= control target key end

     0   :  { %vm76_vm0 = vcmask 1043456   ;;  %vm63_vm1 = vcmask 31744   ;;  %v427_v3 = vmov 0   ;;  %vm179_vm2 = vcmask 261120   ;;  %s527_s0 = inlined_call_operand.vmem [shape: f32[4,128], index: 0, kind: input, shape index: {}]   ;;  %s528_s1 = inlined_call_operand.vmem [shape: f32[32,4], index: 1, kind: input, shape index: {}]   ;;  %s529_s2 = inlined_call_operand.vmem [shape: f32[32,1], index: 2, kind: input, shape index: {}]   ;;  %s530_s6 = inlined_call_operand.<no memory space> [shape: f32[1,1], index: 6, kind: input, shape index: {}]   ;;  %s531_s4 = inlined_call_operand.vmem [shape: f32[16,1], index: 4, kind: input, shape index: {}]   ;;  %s532_s3 = inlined_call_operand.vmem [shape: f32[16,32], index: 3, kind: input, shape index: {}]   ;;  %s533_s5 = inlined_call_operand.vmem [shape: f32[1,16], index: 5, kind: input, shape index: {}]   ;;  %s534_s7 = inlined_call_operand.vmem [shape: f32[1,128], index: 7, kind: output, shape index: {}]  }
   0x1   :  { %v42_v0 = vld [vmem:[%s527_s0] sm:$0xf]  ;;  %v29_v2 = vld [vmem:[%s528_s1 + $0x8] sm:$0xff]  ;;  %421 = vset.pattern.permute.xlu0 %v427_v3  ;;  %422 = vset.pattern.permute.xlu1 %v427_v3  ;;  %v12_v4 = vstv %s530_s6  ;;  %v30_v5 = vld [vmem:[%s528_s1 + $0x10] sm:$0xff]  ;;  %v428_v34 = vmov 0.0|0.0   ;;  %vm429_vm3 = vmmov 0   ;;  %v268_v46 = vlaneseq }
   0x2   :  { %v28_v1 = vld [vmem:[%s528_s1] sm:$0xff]  ;;  %380 = vmatprep.subr.msk.mxu0 %vm76_vm0, %v42_v0  ;;  %13 = vst [vmem:[#allocation2] sm:$0x1] %v12_v4  ;;  %v37_v7 = vld [vmem:[%s529_s2 + $0x10] sm:$0xff]  ;;  %v36_v8 = vld [vmem:[%s529_s2 + $0x8] sm:$0xff]  ;;  %v430_v35 = vmov 0.0  }
   0x3   :  { %382 = vmatprep.mubr.msk.f32.mxu0 %vm63_vm1, %v28_v1  ;;  %v35_v6 = vld [vmem:[%s529_s2] sm:$0xff]  ;;  %381 = vmatpush3.msk.msra.mxu0 %vm76_vm0, %v42_v0  ;;  %v31_v9 = vld [vmem:[%s528_s1 + $0x18] sm:$0xff]  ;;  %v40_v12 = vld [vmem:[%s531_s4 + $0x8] sm:$0xff]  ;;  %vm272_vm4 = vcmask 130048   ;;  %v269_v47 = vshrl.u32 %v268_v46, 7 }
   0x4   :  { %45 = vperm.xlu0 %421, %v35_v6   ;;  %383 = vmatmul.mubr.msk.f32.vlgmr.msra.gmra.mrb[0].mxu0 %vm63_vm1, %v29_v2  ;;  %v38_v10 = vld [vmem:[%s529_s2 + $0x18] sm:$0xff]  ;;  %v39_v11 = vld [vmem:[%s531_s4] sm:$0xff]  ;;  %v33_v33 = vld [vmem:[%s532_s3 + $0x8] sm:$0xff] }
   0x5   :  { %55 = vperm.xlu1 %422, %v37_v7   ;;  %385 = vmatprep.mubr.msk.f32.mxu0 %vm63_vm1, %v30_v5  ;;  %v32_v14 = vld [vmem:[%s532_s3] sm:$0xff]  ;;  %v270_v48 = vsub.s32 0, %v269_v47 }
   0x6   :  { %396 = vmatprep.mubr.msk.f32.mxu1 %vm179_vm2, %v32_v14  ;;  %414 = vmatprep.subr.bf16.mxu0 %v428_v34  ;;  %v34_v45 = vld [vmem:[%s533_s5] sm:$0x1] }
   0x8   :  { %50 = vperm.xlu0 %421, %v36_v8   ;;  %386 = vmatmul.mubr.msk.f32.gmra.mrb[2].mxu0 %vm63_vm1, %v31_v9 }
   0x9   :  { %60 = vperm.xlu1 %422, %v38_v10   ;;  %v41_v13 = vld [vmem:[#allocation2] sm:$0x1]  ;;  %403 = vmatprep.mubr.msk.f32.mxu0 %vm429_vm3, %v430_v35 }
   0xc   :  { %171 = vperm.xlu0 %421, %v39_v11  }
   0xd   :  { %176 = vperm.xlu1 %422, %v40_v12  }
  0x10   :  { %265 = vperm.xlu0 %421, %v41_v13  }
  0x83   :  { %v46_v15 = vpop.permute.xlu0 %45 }
  0x84   :  { %v56_v16 = vpop.permute.xlu1 %55 }
  0x87   :  { %v51_v17 = vpop.permute.xlu0 %50 }
  0x88   :  { %v61_v23 = vpop.permute.xlu1 %60 }
  0x8b   :  { %v172_v38 = vpop.permute.xlu0 %171 }
  0x8c   :  { %v177_v36 = vpop.permute.xlu1 %176 }
  0x8f   :  { %v266_v49 = vpop.permute.xlu0 %265 }
  0x90   :  { %v271_v50 = vrot.slane %v266_v49, %v270_v48 }
  0xd7   :  { %v384_v18 = vpop.f32.mrb[0].mxu0 }
  0xd8   :  { %v152_v19 = vadd.f32 %v384_v18, %v51_v17  ;;  %v146_v20 = vpop.f32.mrb[1].mxu0 }
  0xd9   :  { %v147_v21 = vadd.f32 %v146_v20, %v46_v15 }
  0xda   :  { %v166_v22 = vmax.f32 %v152_v19, 0.0 }
  0xdb   :  { %v165_v24 = vmax.f32 %v147_v21, 0.0  ;;  %v387_v25 = vpop.f32.mrb[2].mxu0 }
  0xdc   :  { %v162_v26 = vadd.f32 %v387_v25, %v61_v23  ;;  %v156_v27 = vpop.f32.mrb[3].mxu0 }
  0xdd   :  { %v157_v28 = vadd.f32 %v156_v27, %v56_v16  ;;  %v406_v29 = vpack.c.bf16 %v166_v22, %v165_v24 }
  0xde   :  { %v168_v30 = vmax.f32 %v162_v26, 0.0 }
  0xdf   :  { %v167_v31 = vmax.f32 %v157_v28, 0.0  ;;  %407 = vmatprep.subr.bf16.mxu1 %v406_v29 }
  0xe0   :  { %409 = vmatpush3.bf16.msra.mxu1 %v406_v29 }
  0xe1   :  { %v410_v32 = vpack.c.bf16 %v168_v30, %v167_v31 }
  0xe3   :  { %411 = vmatprep.subr.bf16.mxu1 %v410_v32 }
  0xe4   :  { %413 = vmatpush3.bf16.msra.mxu1 %v410_v32 }
  0xe7   :  { %397 = vmatmul.mubr.msk.f32.vlgmr.msra.gmra.mrb[0].mxu1 %vm179_vm2, %v33_v33 }
 0x1ba   :  { %v398_v37 = vpop.f32.mrb[0].mxu1 }
 0x1bb   :  { %v258_v39 = vadd.f32 %v398_v37, %v177_v36  ;;  %v252_v40 = vpop.f32.mrb[1].mxu1 }
 0x1bc   :  { %v253_v41 = vadd.f32 %v252_v40, %v172_v38 }
 0x1bd   :  { %v262_v42 = vmax.f32 %v258_v39, 0.0 }
 0x1be   :  { %v261_v43 = vmax.f32 %v253_v41, 0.0 }
 0x1c0   :  { %v415_v44 = vpack.c.bf16 %v262_v42, %v261_v43 }
 0x1c2   :  { %416 = vmatpush3.bf16.msra.mxu0 %v415_v44 }
 0x1c5   :  { %404 = vmatmul.mubr.msk.f32.vlgmr.msra.gmra.mrb[4].mxu0 %vm272_vm4, %v34_v45 }
 0x298   :  { %v342_v51 = vpop.f32.mrb[4].mxu0 }
 0x299   :  { %v343_v52 = vadd.f32 %v342_v51, %v271_v50  ;;  %v405_v53 = vpop.f32.mrb[5].mxu0 }
 0x29b   :  { %v365_v54 = vmul.f32 -1.442695, %v343_v52 }
 0x29d   :  { %423 = vpow2.f32 %v365_v54 }
 0x2a7   :  { %v424_v55 = vpop.eup %423 }
 0x2a8   :  { %v349_v56 = vadd.f32 1.0, %v424_v55 }
 0x2aa   :  { %425 = vrcp.f32 %v349_v56 }
 0x2b4   :  { %v426_v57 = vpop.eup %425 }
 0x2b5   :  { %352 = vst [vmem:[%s534_s7] sm:$0x1] %v426_v57 }

</bundles_post_ra>
